<compile_context>
chip_gen: v7x
topology: tpu7x:2x2x1
jax: 0.10.0
libtpu: 0.0.40
codegen_flags: <defaults>
</compile_context>

<pallas_src>
import functools

import jax
import jax.numpy as jnp
from jax.experimental import pallas as pl
from jax.experimental.pallas import tpu as pltpu


def channel_attention_kernel(x_ref, w1_ref, w2_ref, o_ref, sum_acc, max_acc,
                             *, hw, tile_hw, needs_mask, inv_hw):
    # x_ref:   (B_t, C, TILE_HW)  current spatial slab (native dtype)
    # w1_ref:  (C, C//r)          first 1x1 conv weight (transposed), resident
    # w2_ref:  (C//r, C)          second 1x1 conv weight (transposed), resident
    # o_ref:   (B_t, 1, C)        sigmoid(fc(avg) + fc(max))
    # sum_acc: (B_t, C, 128) f32  per-lane running spatial sum
    # max_acc: (B_t, C, 128)      per-lane running spatial max (native dtype)
    k = pl.program_id(1)
    nk = pl.num_programs(1)
    n_chunks = tile_hw // 128

    @pl.when(k == 0)
    def _init():
        sum_acc[...] = jnp.zeros_like(sum_acc)
        max_acc[...] = jnp.full_like(max_acc, -jnp.inf)

    def accumulate(mask_tail):
        # Pure VPU add/max in the steady state; cross-lane reduce deferred to
        # the finalize so the loop stays on the HBM roofline.
        s = sum_acc[...]
        m = max_acc[...]
        for i in range(n_chunks):
            chunk = x_ref[:, :, i * 128:(i + 1) * 128]     # native dtype
            s = s + chunk.astype(jnp.float32)              # widen sum path only
            if mask_tail:
                # Only the last spatial tile can be partial. Padded lanes are 0
                # (harmless for the sum) and must be -inf for the max.
                lane = jax.lax.broadcasted_iota(jnp.int32, (1, 1, 128), 2)
                valid = (k * tile_hw + i * 128 + lane) < hw
                chunk = jnp.where(valid, chunk,
                                  jnp.array(-jnp.inf, dtype=chunk.dtype))
            m = jnp.maximum(m, chunk)
        sum_acc[...] = s
        max_acc[...] = m

    if needs_mask:
        @pl.when(k < nk - 1)
        def _bulk():
            accumulate(False)

        @pl.when(k == nk - 1)
        def _tail():
            accumulate(True)
    else:
        accumulate(False)

    @pl.when(k == nk - 1)
    def _finalize():
        w1 = w1_ref[...].astype(jnp.float32)
        w2 = w2_ref[...].astype(jnp.float32)

        # Single cross-lane collapse of the per-lane partials.
        avg = jnp.sum(sum_acc[...], axis=-1) * inv_hw                 # (B_t, C)
        mx = jnp.max(max_acc[...].astype(jnp.float32), axis=-1)       # (B_t, C)
        b_t = avg.shape[0]

        # Stack avg/max rows -> one matmul chain instead of two fc() passes.
        pooled = jnp.concatenate([avg, mx], axis=0)                   # (2*B_t, C)
        h = jnp.maximum(
            jnp.dot(pooled, w1, preferred_element_type=jnp.float32), 0.0)
        y = jnp.dot(h, w2, preferred_element_type=jnp.float32)        # (2*B_t, C)

        out = y[:b_t] + y[b_t:]
        o_ref[...] = jax.nn.sigmoid(out).astype(o_ref.dtype).reshape(o_ref.shape)


def _pick_b_tile(B):
    # Largest divisor of B that is <= 8 and still yields >= 2 batch grid points,
    # so the "parallel" axis can shard across both TensorCores on v7x.
    for cand in range(min(8, B // 2), 0, -1):
        if B % cand == 0:
            return cand
    return B


def channel_attention(x, w1_conv, w2_conv, *, tile_hw=None, b_tile=None):
    """x: (B, C, H, W) NCHW.  w1_conv: (C//r, C, 1, 1).  w2_conv: (C, C//r, 1, 1).
    Returns (B, C, 1, 1), matching the PyTorch module."""
    B, C, H, W = x.shape
    hidden = w1_conv.shape[0]
    HW = H * W
    itemsize = jnp.dtype(x.dtype).itemsize

    if b_tile is None:
        b_tile = _pick_b_tile(B)
    assert B % b_tile == 0
    nb = B // b_tile

    # Generation-aware VMEM budget (64 MiB/TC on v7x, 128 MiB on v5e/v6e).
    try:
        info = pltpu.get_tpu_info()
        vmem_cap = int(getattr(info, "vmem_capacity_bytes", 64 * 1024 * 1024))
    except Exception:  # conservative fallback (legal on every generation)
        vmem_cap = 64 * 1024 * 1024
    vmem_budget = (vmem_cap * 3) // 4

    # VMEM that is not the double-buffered x stream.
    wbytes = jnp.dtype(w1_conv.dtype).itemsize
    fixed_bytes = (2 * 2 * C * hidden * wbytes              # double-buffered weights
                   + b_tile * C * 128 * (4 + itemsize)      # sum/max accumulators
                   + 2 * b_tile * C * itemsize              # output block
                   + (1 << 20))                             # slack

    hw_lane_groups = pl.cdiv(HW, 128)
    if tile_hw is None:
        # Target ~4 MiB x blocks: big enough to amortize the ~0.35 us/step
        # overhead, small enough to double-buffer on every generation.
        tile_hw = (4 << 20) // max(1, b_tile * C * itemsize)
    max_tile = (vmem_budget - fixed_bytes) // max(1, 2 * b_tile * C * itemsize)
    tile_hw = min(tile_hw, max_tile, hw_lane_groups * 128)
    tile_hw = max(128, (tile_hw // 128) * 128)

    hw_pad = pl.cdiv(HW, tile_hw) * tile_hw
    needs_mask = hw_pad != HW
    nk = hw_pad // tile_hw

    x_flat = x.reshape(B, C, HW)
    if needs_mask:
        # Zero padding: exact for the sum; the max path masks padded lanes
        # to -inf in-kernel (last tile only).
        x_flat = jnp.pad(x_flat, ((0, 0), (0, 0), (0, hw_pad - HW)))

    # 1x1 conv (no bias) on a (B, C, 1, 1) tensor == matmul with weight[:, :, 0, 0].
    w1 = w1_conv[:, :, 0, 0].T   # (C, C//r)
    w2 = w2_conv[:, :, 0, 0].T   # (C//r, C)

    kernel = functools.partial(
        channel_attention_kernel,
        hw=HW, tile_hw=tile_hw, needs_mask=needs_mask, inv_hw=1.0 / HW)

    # Advisory cost: one streaming read of x dominates; matmuls are tiny.
    cost = pl.CostEstimate(
        flops=2 * B * C * HW + 8 * B * C * hidden,
        transcendentals=B * C,
        bytes_accessed=B * C * hw_pad * itemsize
        + 2 * C * hidden * wbytes
        + B * C * itemsize,
    )

    out = pl.pallas_call(
        kernel,
        out_shape=jax.ShapeDtypeStruct((B, 1, C), x.dtype),
        grid=(nb, nk),
        in_specs=[
            pl.BlockSpec((b_tile, C, tile_hw), lambda b, k: (b, 0, k)),
            pl.BlockSpec((C, hidden), lambda b, k: (0, 0)),   # resident weights
            pl.BlockSpec((hidden, C), lambda b, k: (0, 0)),
        ],
        out_specs=pl.BlockSpec((b_tile, 1, C), lambda b, k: (b, 0, 0)),
        scratch_shapes=[
            pltpu.VMEM((b_tile, C, 128), jnp.float32),  # per-lane sum accumulator
            pltpu.VMEM((b_tile, C, 128), x.dtype),      # per-lane max accumulator
        ],
        compiler_params=pltpu.CompilerParams(
            dimension_semantics=("parallel", "arbitrary"),
            vmem_limit_bytes=int(vmem_budget),
        ),
        cost_estimate=cost,
    )(x_flat, w1, w2)

    return out.reshape(B, C, 1, 1)


def _reference(x, w1_conv, w2_conv):
    # Pure-JAX reference of the PyTorch forward, for a sanity check.
    B, C, H, W = x.shape
    xf = x.reshape(B, C, H * W).astype(jnp.float32)
    avg = xf.mean(-1)
    mx = xf.max(-1)
    w1 = w1_conv[:, :, 0, 0].astype(jnp.float32)  # (C//r, C)
    w2 = w2_conv[:, :, 0, 0].astype(jnp.float32)  # (C, C//r)

    def fc(p):
        h = jnp.maximum(p @ w1.T, 0.0)
        return h @ w2.T

    return jax.nn.sigmoid(fc(avg) + fc(mx)).reshape(B, C, 1, 1)


if __name__ == "__main__":
    B, C, ratio = 2, 64, 16
    hidden = C // ratio  # 4

    key = jax.random.PRNGKey(0)
    kx1, kx2, k1, k2 = jax.random.split(key, 4)

    # Deterministic synthetic weights (shapes match nn.Conv2d(..., 1, bias=False)).
    w1_conv = (jax.random.normal(k1, (hidden, C, 1, 1), dtype=jnp.float32)
               * (1.0 / jnp.sqrt(C)))
    w2_conv = (jax.random.normal(k2, (C, hidden, 1, 1), dtype=jnp.float32)
               * (1.0 / jnp.sqrt(hidden)))

    # Case 1: HW divides the tile -> multi-step reduction path, no masking.
    x1 = jax.random.normal(kx1, (B, C, 16, 16), dtype=jnp.float32)
    out1 = jax.block_until_ready(
        channel_attention(x1, w1_conv, w2_conv, tile_hw=128))
    ref1 = _reference(x1, w1_conv, w2_conv)
    assert out1.shape == (B, C, 1, 1)
    assert jnp.allclose(out1, ref1, atol=1e-5, rtol=1e-5)

    # Case 2: ragged spatial extent -> last-tile -inf mask path, auto tile size.
    x2 = jax.random.normal(kx2, (B, C, 15, 15), dtype=jnp.float32)
    out2 = jax.block_until_ready(channel_attention(x2, w1_conv, w2_conv))
    ref2 = _reference(x2, w1_conv, w2_conv)
    assert out2.shape == (B, C, 1, 1)
    assert jnp.allclose(out2, ref2, atol=1e-5, rtol=1e-5)

    print("KERNEL_OK")
</pallas_src>

<mosaic_0001>
module attributes {stable_mosaic.version = 11 : i64} {
  func.func @channel_attention_kernel(%arg0: i32, %arg1: i32, %arg2: memref<1x64x128xf32, #tpu.memory_space<vmem>>, %arg3: memref<64x4xf32, #tpu.memory_space<vmem>>, %arg4: memref<4x64xf32, #tpu.memory_space<vmem>>, %arg5: memref<1x1x64xf32, #tpu.memory_space<vmem>>, %arg6: memref<1x64x128xf32, #tpu.memory_space<vmem>>, %arg7: memref<1x64x128xf32, #tpu.memory_space<vmem>>) attributes {dimension_semantics = [#tpu.dimension_semantics<parallel>, #tpu.dimension_semantics<arbitrary>], iteration_bounds = array<i64: 2, 2>, scalar_prefetch = 0 : i64, scratch_operands = 2 : i64, tpu.core_type = #tpu.core_type<tc>, window_params = [{transform_indices = @transform_0, window_bounds = array<i64: 1, 64, 128>}, {pipeline_mode = #tpu.pipeline_mode<synchronous>, transform_indices = @transform_1, window_bounds = array<i64: 64, 4>}, {pipeline_mode = #tpu.pipeline_mode<synchronous>, transform_indices = @transform_2, window_bounds = array<i64: 4, 64>}, {transform_indices = @transform_3, window_bounds = array<i64: 1, 1, 64>}]} {
    %c0_i32 = arith.constant 0 : i32
    %0 = arith.cmpi eq, %arg1, %c0_i32 : i32
    %1 = arith.extui %0 : i1 to i32
    %c0_i32_0 = arith.constant 0 : i32
    %2 = arith.cmpi ne, %1, %c0_i32_0 : i32
    scf.if %2 {
      %cst = arith.constant 0.000000e+00 : f32
      %13 = vector.broadcast %cst : f32 to vector<1x64x128xf32>
      %c0_16 = arith.constant 0 : index
      %c0_17 = arith.constant 0 : index
      %c0_18 = arith.constant 0 : index
      %14 = vector.load %arg6[%c0_16, %c0_17, %c0_18] : memref<1x64x128xf32, #tpu.memory_space<vmem>>, vector<1x64x128xf32>
      tpu.vector_store %arg6[%c0_16, %c0_17, %c0_18], %13 {strides = array<i32>} : memref<1x64x128xf32, #tpu.memory_space<vmem>>, vector<1x64x128xf32>,
      %cst_19 = arith.constant 0xFF800000 : f32
      %15 = vector.broadcast %cst_19 : f32 to vector<1x64x128xf32>
      %c0_20 = arith.constant 0 : index
      %c0_21 = arith.constant 0 : index
      %c0_22 = arith.constant 0 : index
      %16 = vector.load %arg7[%c0_20, %c0_21, %c0_22] : memref<1x64x128xf32, #tpu.memory_space<vmem>>, vector<1x64x128xf32>
      tpu.vector_store %arg7[%c0_20, %c0_21, %c0_22], %15 {strides = array<i32>} : memref<1x64x128xf32, #tpu.memory_space<vmem>>, vector<1x64x128xf32>,
    } else {
    }
    %c0 = arith.constant 0 : index
    %c0_1 = arith.constant 0 : index
    %c0_2 = arith.constant 0 : index
    %3 = vector.load %arg6[%c0, %c0_1, %c0_2] : memref<1x64x128xf32, #tpu.memory_space<vmem>>, vector<1x64x128xf32>
    %c0_3 = arith.constant 0 : index
    %c0_4 = arith.constant 0 : index
    %c0_5 = arith.constant 0 : index
    %4 = vector.load %arg7[%c0_3, %c0_4, %c0_5] : memref<1x64x128xf32, #tpu.memory_space<vmem>>, vector<1x64x128xf32>
    %c0_6 = arith.constant 0 : index
    %c0_7 = arith.constant 0 : index
    %c0_8 = arith.constant 0 : index
    %5 = vector.load %arg2[%c0_6, %c0_7, %c0_8] : memref<1x64x128xf32, #tpu.memory_space<vmem>>, vector<1x64x128xf32>
    %6 = arith.addf %3, %5 : vector<1x64x128xf32>
    %7 = arith.maximumf %4, %5 : vector<1x64x128xf32>
    %c0_9 = arith.constant 0 : index
    %c0_10 = arith.constant 0 : index
    %c0_11 = arith.constant 0 : index
    %8 = vector.load %arg6[%c0_9, %c0_10, %c0_11] : memref<1x64x128xf32, #tpu.memory_space<vmem>>, vector<1x64x128xf32>
    tpu.vector_store %arg6[%c0_9, %c0_10, %c0_11], %6 {strides = array<i32>} : memref<1x64x128xf32, #tpu.memory_space<vmem>>, vector<1x64x128xf32>,
    %c0_12 = arith.constant 0 : index
    %c0_13 = arith.constant 0 : index
    %c0_14 = arith.constant 0 : index
    %9 = vector.load %arg7[%c0_12, %c0_13, %c0_14] : memref<1x64x128xf32, #tpu.memory_space<vmem>>, vector<1x64x128xf32>
    tpu.vector_store %arg7[%c0_12, %c0_13, %c0_14], %7 {strides = array<i32>} : memref<1x64x128xf32, #tpu.memory_space<vmem>>, vector<1x64x128xf32>,
    %c1_i32 = arith.constant 1 : i32
    %10 = arith.cmpi eq, %arg1, %c1_i32 : i32
    %11 = arith.extui %10 : i1 to i32
    %c0_i32_15 = arith.constant 0 : i32
    %12 = arith.cmpi ne, %11, %c0_i32_15 : i32
    scf.if %12 {
      %c0_16 = arith.constant 0 : index
      %c0_17 = arith.constant 0 : index
      %13 = vector.load %arg3[%c0_16, %c0_17] : memref<64x4xf32, #tpu.memory_space<vmem>>, vector<64x4xf32>
      %c0_18 = arith.constant 0 : index
      %c0_19 = arith.constant 0 : index
      %14 = vector.load %arg4[%c0_18, %c0_19] : memref<4x64xf32, #tpu.memory_space<vmem>>, vector<4x64xf32>
      %c0_20 = arith.constant 0 : index
      %c0_21 = arith.constant 0 : index
      %c0_22 = arith.constant 0 : index
      %15 = vector.load %arg6[%c0_20, %c0_21, %c0_22] : memref<1x64x128xf32, #tpu.memory_space<vmem>>, vector<1x64x128xf32>
      %cst = arith.constant dense<0.000000e+00> : vector<1x64xf32>
      %16 = vector.multi_reduction <add>, %15, %cst [2] : vector<1x64x128xf32> to vector<1x64xf32>
      %cst_23 = arith.constant 3.906250e-03 : f32
      %17 = vector.broadcast %cst_23 : f32 to vector<1x64xf32>
      %18 = arith.mulf %16, %17 : vector<1x64xf32>
      %c0_24 = arith.constant 0 : index
      %c0_25 = arith.constant 0 : index
      %c0_26 = arith.constant 0 : index
      %19 = vector.load %arg7[%c0_24, %c0_25, %c0_26] : memref<1x64x128xf32, #tpu.memory_space<vmem>>, vector<1x64x128xf32>
      %cst_27 = arith.constant dense<0xFF800000> : vector<1x64xf32>
      %20 = vector.multi_reduction <maximumf>, %19, %cst_27 [2] : vector<1x64x128xf32> to vector<1x64xf32>
      %21 = tpu.concatenate %18, %20 in 0 : vector<1x64xf32>, vector<1x64xf32> -> vector<2x64xf32>
      %cst_28 = arith.constant dense<0.000000e+00> : vector<2x4xf32>
      %22 = tpu.matmul %21, %13, %cst_28 {dimension_numbers = #tpu.dot_dimension_numbers<[1], [0], [0], [1], [0, 0, 1, 1], [], []>} : vector<2x64xf32>, vector<64x4xf32>, vector<2x4xf32> -> vector<2x4xf32>
      %cst_29 = arith.constant 0.000000e+00 : f32
      %23 = vector.broadcast %cst_29 : f32 to vector<2x4xf32>
      %24 = arith.maximumf %22, %23 : vector<2x4xf32>
      %cst_30 = arith.constant dense<0.000000e+00> : vector<2x64xf32>
      %25 = tpu.matmul %24, %14, %cst_30 {dimension_numbers = #tpu.dot_dimension_numbers<[1], [0], [0], [1], [0, 0, 1, 1], [], []>} : vector<2x4xf32>, vector<4x64xf32>, vector<2x64xf32> -> vector<2x64xf32>
      %26 = vector.extract_strided_slice %25 {offsets = [0, 0], sizes = [1, 64], strides = [1, 1]} : vector<2x64xf32> to vector<1x64xf32>
      %27 = vector.extract_strided_slice %25 {offsets = [1, 0], sizes = [1, 64], strides = [1, 1]} : vector<2x64xf32> to vector<1x64xf32>
      %28 = arith.addf %26, %27 : vector<1x64xf32>
      %29 = arith.negf %28 : vector<1x64xf32>
      %30 = math.exp %29 : vector<1x64xf32>
      %cst_31 = arith.constant 1.000000e+00 : f32
      %31 = vector.broadcast %cst_31 : f32 to vector<1x64xf32>
      %32 = arith.addf %31, %30 : vector<1x64xf32>
      %33 = arith.divf %31, %32 : vector<1x64xf32>
      %34 = vector.shape_cast %33 : vector<1x64xf32> to vector<1x1x64xf32>
      %c0_32 = arith.constant 0 : index
      %c0_33 = arith.constant 0 : index
      %c0_34 = arith.constant 0 : index
      %35 = vector.load %arg5[%c0_32, %c0_33, %c0_34] : memref<1x1x64xf32, #tpu.memory_space<vmem>>, vector<1x1x64xf32>
      tpu.vector_store %arg5[%c0_32, %c0_33, %c0_34], %34 {strides = array<i32>} : memref<1x1x64xf32, #tpu.memory_space<vmem>>, vector<1x1x64xf32>,
    } else {
    }
    return
  }
  func.func @transform_0(%arg0: i32, %arg1: i32) -> (i32, i32, i32) {
    %c0_i32 = arith.constant 0 : i32
    %c0_i32_0 = arith.constant 0 : i32
    return %arg0, %c0_i32, %arg1 : i32, i32, i32
  }
  func.func @transform_1(%arg0: i32, %arg1: i32) -> (i32, i32) {
    %c0_i32 = arith.constant 0 : i32
    %c0_i32_0 = arith.constant 0 : i32
    %c0_i32_1 = arith.constant 0 : i32
    return %c0_i32, %c0_i32_0 : i32, i32
  }
  func.func @transform_2(%arg0: i32, %arg1: i32) -> (i32, i32) {
    %c0_i32 = arith.constant 0 : i32
    %c0_i32_0 = arith.constant 0 : i32
    %c0_i32_1 = arith.constant 0 : i32
    return %c0_i32, %c0_i32_0 : i32, i32
  }
  func.func @transform_3(%arg0: i32, %arg1: i32) -> (i32, i32, i32) {
    %c0_i32 = arith.constant 0 : i32
    %c0_i32_0 = arith.constant 0 : i32
    %c0_i32_1 = arith.constant 0 : i32
    return %arg0, %c0_i32, %c0_i32_0 : i32, i32, i32
  }
}

</mosaic_0001>

<bundles_post_ra>
// kernel: tpu_custom_call.1
= control target key start
LH: loop header
LB: loop body
LE: loop exit
PB: predicated region body
PF: predicated region fallthrough
CT: control target
= control target key end

     0   :  { %8 = vsyncpa [#allocation5], 0  ;;  %s1348_s0 = inlined_call_operand.hbm [shape: f32[2,64,256], index: 0, kind: input, shape index: {}]   ;;  %s1349_s1 = inlined_call_operand.vmem [shape: f32[64,4], index: 1, kind: input, shape index: {}]   ;;  %s1350_s2 = inlined_call_operand.vmem [shape: f32[4,64], index: 2, kind: input, shape index: {}]   ;;  %s1351_s3 = inlined_call_operand.hbm [shape: f32[2,1,64], index: 3, kind: output, shape index: {}]  }
   0x1   :  { %10 = vsyncpa [#allocation5 + $0x1], 0 }
   0x2   :  { %11 = vsyncpa [#allocation6], 0 }
   0x3   :  { %13 = vsyncpa [#allocation6 + $0x1], 0  ;;  %s1082_s12 = smov 0   ;;  %s1084_s13 = smov 0  }
   0x4   :  { %s1086_s14 = smov 0   ;;  %s1088_s15 = smov 0  }
   0x5   :  { %s1090_s16 = smov 0   ;;  %s1092_s17 = smov 0  }
   0x6   :  { %s1094_s18 = smov 0   ;;  %s1096_s19 = smov 0  }
   0x7   :  { %s1098_s20 = smov 0   ;;  %s1100_s21 = smov 0  }
   0x8   :  { %s1102_s22 = smov 0  }
   0x9 LB: > { %s719_s23 = sadd.s32 4294967295, %s1050_s22   ;;  %s720_s24 = sadd.s32 4294967294, %s1050_s22   ;;  %s1050_s22 = sphi %s1102_s22, %s19_s22   ;;  %s1046_s21 = sphi %s1100_s21, %s1375_s21   ;;  %s1042_s20 = sphi %s1098_s20, %s1374_s20   ;;  %s1038_s19 = sphi %s1096_s19, %s1373_s19   ;;  %s1034_s18 = sphi %s1094_s18, %s1372_s18   ;;  %s1030_s17 = sphi %s1092_s17, %s1371_s17   ;;  %s1026_s16 = sphi %s1090_s16, %s1370_s16   ;;  %s1022_s15 = sphi %s1088_s15, %s1369_s15   ;;  %s1018_s14 = sphi %s1086_s14, %s1368_s14   ;;  %s1014_s13 = sphi %s1084_s13, %s1367_s13   ;;  %s1010_s12 = sphi %s1082_s12, %s1366_s12  }
   0xa   : > { %s28_s25 = sadd.s32 1, %s1042_s20  ;;  %s31_s26 = sadd.s32 1, %s1046_s21 }
   0xb   : > { %p29_p0 = scmp.ge.s32.totalorder %s28_s25, 2  ;;  %s40_s27 = sadd.s32 1, %s1030_s17 }
   0xc   : > { %p47_p1 = scmp.ne.s32.totalorder %s1030_s17, %s1026_s16  ;;  %p48_p2 = scmp.eq.s32.totalorder %s1050_s22, 0 }
   0xd   : > { %s1377_s25 = smov (%p29_p0, %s28_s25), 0  ;;  %s1379_s26 = smov (!%p29_p0, %s31_s26), %s1046_s21 }
   0xe   : > { %1355 = sst [smem:[#allocation10_spill]] %s1377_s25  ;;  %s36_s28 = ssub.s32 %s1042_s20, %s1377_s25 }
   0xf   : > { %p1148_p3 = por %p48_p2, %p47_p1  ;;  %p33_p4 = scmp.ge.s32.totalorder %s1379_s26, 2 }
  0x10   : > { %p53_p5 = scmp.ne.s32.totalorder %s1026_s16, %s1022_s15  ;;  %p54_p6 = scmp.eq.s32.totalorder %s719_s23, 0 }
  0x11   : > { %s108_s30 = sadd.s32 1, %s1018_s14  ;;  %s1381_s26 = smov (%p33_p4, %s1379_s26), 0 }
  0x12   : > { %1357 = sst [smem:[#allocation11_spill]] %s1381_s26  ;;  %p1156_p7 = por %p54_p6, %p53_p5 }
  0x13   : > { %p118_p8 = scmp.ne.s32.totalorder %s1018_s14, %s1014_s13  ;;  %s35_s5 = ssub.s32 %s1046_s21, %s1381_s26 }
  0x14   : > { %p119_p9 = scmp.eq.s32.totalorder %s719_s23, 3  ;;  %s37_s6 = sor.u32 %s36_s28, %s35_s5 }
  0x15   : > { %p106_p10 = scmp.eq.s32.totalorder %s35_s5, 0  ;;  %p38_p11 = scmp.eq.s32.totalorder %s37_s6, 0 }
  0x16   : > { %p1164_p12 = por %p119_p9, %p118_p8  ;;  %p124_p13 = scmp.ne.s32.totalorder %s1014_s13, %s1010_s12 }
  0x17   : > { %s1169_s8 = scalar_select %p106_p10, %s1018_s14, %s108_s30  }
  0x18   : > { %s1359_s7 = scalar_select %p1164_p12, 1, 0 }
  0x19   : > { %s1172_s9 = scalar_select %p38_p11, %s1030_s17, %s40_s27  }
  0x1a   : > { %p125_p0 = scmp.eq.s32.totalorder %s720_s24, 3  ;;  %p796_p1 = scmp.lt.s32.totalorder %s1050_s22, 4 }
  0x1b   : > { %s151_s11 = sand.u32 1, %s1030_s17   ;;  %s724_s23 = sshll.u32 %s1046_s21, 4 }
  0x1c   : > { %p1177_p2 = por %p125_p0, %p124_p13  ;;  %s723_s15 = sshll.u32 %s151_s11, 6 }
  0x1d   : > { %s160_s28 = sadd.s32 %s1042_s20, %s724_s23  ;;  %s155_s5 = scalar_lea.vmem [#allocation4], %s723_s15 }
  0x1e   : > { %s1360_s10 = scalar_select %p1177_p2, 1, 0 }
  0x1f   : > { %s163_s6 = sshll.u32 %s155_s5, 4  ;;  %s725_s26 = sshll.u32 %s160_s28, 7  ;;  %s1184_s6 = int_to_ptr.vmem [resolvable:$true] %s163_s6 }
  0x20   : > { %s1189_s27 = scalar_lea.hbm %s1348_s0, %s725_s26  ;;  %p1193_p4 = pnand %p796_p1, %p1148_p3 }
  0x21   : > { %s1197_s15 = scalar_lea.sflag [#allocation5], %s151_s11  ;;  %s898_s23 = scalar_lea.hbm %s1189_s27, 1024 }
  0x22   : > { %p899_p5 = scmp.ne.s32.totalorder %s1189_s27, %s898_s23  ;;  %p900_p6 = pneg %p1193_p4 }
  0x23   : > { %s903_s29 = scalar_lea.hbm %s1348_s0, 4096  ;;  %p904_p3 = scmp.lt.u32.totalorder %s1189_s27, %s1348_s0 }
  0x24   : > { %p901_p8 = pnand %p900_p6, %p899_p5  ;;  %p905_p10 = scmp.lt.u32.totalorder %s903_s29, %s898_s23 }
  0x25   : > { %p907_p13 = scmp.lt.u32.totalorder %s898_s23, %s1189_s27 }
  0x26   : > { %p902_p9 = pneg %p901_p8  ;;  %p906_p11 = por %p905_p10, %p904_p3 }
  0x28   : > { %p908_p0 = por %p907_p13, %p906_p11 }
  0x2a   : > { %p909_p1 = pnand %p908_p0, %p902_p9 }
  0x2c   : > { %912 = shalt.err (!%p909_p1)
}
  0x2d   : > { %s913_s11 = scalar_lea.vmem %s1184_s6, 1024  ;;  %s1052_s30 = smov [#allocation4]  }
  0x2e   : > { %p914_p5 = scmp.ne.s32.totalorder %s1184_s6, %s913_s11  ;;  %s918_s25 = sshll.u32 %s1052_s30, 4  ;;  %s919_s25 = int_to_ptr.vmem [resolvable:$false] %s918_s25 }
  0x2f   : > { %s920_s26 = scalar_lea.vmem %s919_s25, 2048  ;;  %p921_p12 = scmp.lt.s32.totalorder %s1184_s6, %s919_s25 }
  0x30   : > { %p916_p8 = pnand %p914_p5, %p900_p6  ;;  %p922_p3 = scmp.lt.s32.totalorder %s920_s26, %s913_s11 }
  0x32   : > { %p917_p2 = pneg %p916_p8  ;;  %p923_p10 = por %p922_p3, %p921_p12 }
  0x34   : > { %p924_p11 = pnand %p923_p10, %p917_p2 }
  0x36   : > { %927 = shalt.err (!%p924_p11)
}
  0x37   : > { %s1053_s23 = smov 256   ;;  %s1054_s29 = smov 128  }
  0x38   : > { %s1055_s28 = smov 8   ;;  %p726_p6 = scmp.ge.s32.totalorder %s1050_s22, 1 }
  0x39   : > { %791 = dma.hbm_to_vmem [thread:$0]  (!%p1193_p4), %s1189_s27, 1024, %s1184_s6, %s1197_s15, %s1053_s23, %s1054_s29, %s1055_s28  }
  0x3a   : > { %p171_p9 = scmp.lt.s32.totalorder %s1050_s22, 5 }
  0x3c   : > { %p172_p13 = pnand %p726_p6, %p171_p9 }
  0x3d   : > { %s177_s5 = sand.u32 (!%p172_p13), 1, %s1026_s16  }
  0x3e   : > { %175 = sbr.rel (%p172_p13) target bundleno = 749 (0x2ed), region = 32  ;;  %s727_s11 = sshll.u32 (!%p172_p13), %s177_s5, 6 }
  0x3f   : > { %s178_s30 = scalar_lea.sflag (!%p172_p13), [#allocation5], %s177_s5  ;;  %s1228_s25 = scalar_lea.vmem (!%p172_p13), [#allocation4], %s727_s11 }
  0x45   : > { %1001 = dma.done.wait (%p1156_p7), %s178_s30, 1024  }
  0x46   : > { %1003 = vsyncadd (%p1156_p7), %s178_s30, 4294966272  ;;  %s201_s24 = sand.u32 1, %s1014_s13   ;;  %p728_p12 = scmp.ne.s32.totalorder %s1034_s18, 0 }
  0x47   : > { %s1237_s6 = scalar_lea.vmem [#allocation7], %s201_s24  ;;  %v1056_v0 = vmov (!%p728_p12), 0.0   ;;  %v1057_v1 = vmov (!%p728_p12), -inf  }
  0x48   : > { %206 = sbr.rel (%p728_p12) target bundleno = 80 (0x50), region = 40  ;;  %207 = vst [vmem:[#allocation2] sm:$0xff] (!%p728_p12), %v1056_v0  ;;  %208 = vst [vmem:[#allocation2 + $0x8] sm:$0xff] (!%p728_p12), %v1056_v0 }
  0x49   : > { %209 = vst [vmem:[#allocation2 + $0x10] sm:$0xff] (!%p728_p12), %v1056_v0  ;;  %210 = vst [vmem:[#allocation2 + $0x18] sm:$0xff] (!%p728_p12), %v1056_v0 }
  0x4a   : > { %211 = vst [vmem:[#allocation2 + $0x20] sm:$0xff] (!%p728_p12), %v1056_v0  ;;  %212 = vst [vmem:[#allocation2 + $0x28] sm:$0xff] (!%p728_p12), %v1056_v0 }
  0x4b   : > { %213 = vst [vmem:[#allocation2 + $0x30] sm:$0xff] (!%p728_p12), %v1056_v0  ;;  %214 = vst [vmem:[#allocation2 + $0x38] sm:$0xff] (!%p728_p12), %v1056_v0 }
  0x4c   : > { %215 = vst [vmem:[#allocation3] sm:$0xff] (!%p728_p12), %v1057_v1  ;;  %216 = vst [vmem:[#allocation3 + $0x8] sm:$0xff] (!%p728_p12), %v1057_v1 }
  0x4d   : > { %217 = vst [vmem:[#allocation3 + $0x10] sm:$0xff] (!%p728_p12), %v1057_v1  ;;  %218 = vst [vmem:[#allocation3 + $0x18] sm:$0xff] (!%p728_p12), %v1057_v1 }
  0x4e   : > { %219 = vst [vmem:[#allocation3 + $0x20] sm:$0xff] (!%p728_p12), %v1057_v1  ;;  %220 = vst [vmem:[#allocation3 + $0x28] sm:$0xff] (!%p728_p12), %v1057_v1 }
  0x4f   : > { %221 = vst [vmem:[#allocation3 + $0x30] sm:$0xff] %v1057_v1  ;;  %222 = vst [vmem:[#allocation3 + $0x38] sm:$0xff] %v1057_v1 }
  0x50 PF: > { %v223_v2 = vld [vmem:[#allocation2] sm:$0xff]  ;;  %v224_v4 = vld [vmem:[#allocation2 + $0x8] sm:$0xff]  ;;  %v241_v8 = vld [vmem:[%s1228_s25 + $0x10] sm:$0xff]  ;;  %p729_p7 = scmp.ne.s32.totalorder %s1034_s18, 1 }
  0x51   : > { %v239_v3 = vld [vmem:[%s1228_s25] sm:$0xff]  ;;  %v240_v6 = vld [vmem:[%s1228_s25 + $0x8] sm:$0xff]  ;;  %v225_v7 = vld [vmem:[#allocation2 + $0x10] sm:$0xff]  ;;  %v1058_v61 = vmov (!%p729_p7), 0.0|0.0   ;;  %vm1059_vm0 = vmmov (!%p729_p7), 0   ;;  %vm367_vm1 = vcmask (!%p729_p7), 130112  }
  0x52   : > { %v247_v5 = vadd.f32 %v239_v3, %v223_v2  ;;  %v248_v9 = vadd.f32 %v240_v6, %v224_v4  ;;  %v249_v10 = vadd.f32 %v241_v8, %v225_v7  ;;  %v226_v11 = vld [vmem:[#allocation2 + $0x18] sm:$0xff]  ;;  %v227_v13 = vld [vmem:[#allocation2 + $0x20] sm:$0xff]  ;;  %v228_v16 = vld [vmem:[#allocation2 + $0x28] sm:$0xff]  ;;  %772 = vmatprep.subr.bf16.mxu0 (!%p729_p7), %v1058_v61  ;;  %v1060_v7 = vmov (!%p729_p7), 0.0  }
  0x53   : > { %v242_v12 = vld [vmem:[%s1228_s25 + $0x18] sm:$0xff]  ;;  %v243_v15 = vld [vmem:[%s1228_s25 + $0x20] sm:$0xff]  ;;  %v244_v17 = vld [vmem:[%s1228_s25 + $0x28] sm:$0xff]  ;;  %764 = vmatprep.mubr.msk.f32.mxu0 (!%p729_p7), %vm1059_vm0, %v1060_v7  ;;  %767 = vmatprep.subr.mxu1 (!%p729_p7), %v1060_v7  ;;  %vm374_vm2 = vcmask (!%p729_p7), 195712   ;;  %vm381_vm3 = vcmask (!%p729_p7), 261312   ;;  %vm388_vm4 = vcmask (!%p729_p7), 326912  }
  0x54   : > { %263 = vst [vmem:[#allocation2] sm:$0xff] %v247_v5  ;;  %v250_v14 = vadd.f32 %v242_v12, %v226_v11  ;;  %264 = vst [vmem:[#allocation2 + $0x8] sm:$0xff] %v248_v9  ;;  %v251_v18 = vadd.f32 %v243_v15, %v227_v13  ;;  %v252_v19 = vadd.f32 %v244_v17, %v228_v16  ;;  %v229_v20 = vld [vmem:[#allocation2 + $0x30] sm:$0xff]  ;;  %v230_v22 = vld [vmem:[#allocation2 + $0x38] sm:$0xff]  ;;  %769 = vmatprep.mubr.msk.f32.mxu1 (!%p729_p7), %vm1059_vm0, %v1060_v7  ;;  %vm395_vm5 = vcmask (!%p729_p7), 392512  }
  0x55   : > { %265 = vst [vmem:[#allocation2 + $0x10] sm:$0xff] %v249_v10  ;;  %v245_v21 = vld [vmem:[%s1228_s25 + $0x30] sm:$0xff]  ;;  %v246_v24 = vld [vmem:[%s1228_s25 + $0x38] sm:$0xff]  ;;  %v231_v25 = vld [vmem:[#allocation3] sm:$0xff]  ;;  %v356_v10 = vlaneseq (!%p729_p7)  ;;  %vm402_vm6 = vcmask (!%p729_p7), 458112   ;;  %vm409_vm7 = vcmask (!%p729_p7), 523712  }
  0x56   : > { %266 = vst [vmem:[#allocation2 + $0x18] sm:$0xff] %v250_v14  ;;  %v253_v23 = vadd.f32 %v245_v21, %v229_v20  ;;  %v232_v26 = vld [vmem:[#allocation3 + $0x8] sm:$0xff]  ;;  %267 = vst [vmem:[#allocation2 + $0x20] sm:$0xff] %v251_v18  ;;  %v254_v27 = vadd.f32 %v246_v24, %v230_v22  ;;  %v255_v28 = vmax.f32 %v231_v25, %v239_v3  ;;  %v233_v30 = vld [vmem:[#allocation3 + $0x10] sm:$0xff]  ;;  %282 = sbr.rel (%p729_p7) target bundleno = 724 (0x2d4), region = 44  ;;  %vm460_vm8 = vcmask (!%p729_p7), 1040384  }
  0x57   : > { %268 = vst [vmem:[#allocation2 + $0x28] sm:$0xff] %v252_v19  ;;  %v256_v29 = vmax.f32 %v232_v26, %v240_v6  ;;  %v234_v31 = vld [vmem:[#allocation3 + $0x18] sm:$0xff]  ;;  %v235_v32 = vld [vmem:[#allocation3 + $0x20] sm:$0xff]  ;;  %v257_v33 = vmax.f32 %v233_v30, %v241_v8  ;;  %v236_v36 = vld [vmem:[#allocation3 + $0x28] sm:$0xff]  ;;  %v357_v13 = vand.u32 (!%p729_p7), 127, %v356_v10  ;;  %vm462_vm9 = vcmask (!%p729_p7), 523264  }
  0x58   : > { %269 = vst [vmem:[#allocation2 + $0x30] sm:$0xff] %v253_v23  ;;  %v258_v34 = vmax.f32 %v234_v31, %v242_v12  ;;  %v259_v35 = vmax.f32 %v235_v32, %v243_v15  ;;  %v237_v37 = vld [vmem:[#allocation3 + $0x30] sm:$0xff]  ;;  %v238_v38 = vld [vmem:[#allocation3 + $0x38] sm:$0xff]  ;;  %270 = vst [vmem:[#allocation2 + $0x38] sm:$0xff] %v254_v27  ;;  %v260_v39 = vmax.f32 %v236_v36, %v244_v17  ;;  %v359_v17 = vshrl.u32 (!%p729_p7), %v356_v10, 7 }
  0x59   : > { %271 = vst [vmem:[#allocation3] sm:$0xff] %v255_v28  ;;  %272 = vst [vmem:[#allocation3 + $0x8] sm:$0xff] %v256_v29  ;;  %v261_v40 = vmax.f32 %v237_v37, %v245_v21  ;;  %v262_v41 = vmax.f32 %v238_v38, %v246_v24  ;;  %v283_v58 = vld [vmem:[%s1349_s1] sm:$0xff] (!%p729_p7)  ;;  %v284_v59 = vld [vmem:[%s1349_s1 + $0x8] sm:$0xff] (!%p729_p7)  ;;  %v362_v16 = vadd.s32 (!%p729_p7), 4294967288, %v357_v13  ;;  %v369_v22 = vadd.s32 (!%p729_p7), 4294967280, %v357_v13 }
  0x5a   : > { %273 = vst [vmem:[#allocation3 + $0x10] sm:$0xff] %v257_v33  ;;  %274 = vst [vmem:[#allocation3 + $0x18] sm:$0xff] %v258_v34  ;;  %v773_v60 = vpack.c.bf16 (!%p729_p7), %v284_v59, %v283_v58  ;;  %v285_v62 = vld [vmem:[%s1349_s1 + $0x10] sm:$0xff] (!%p729_p7)  ;;  %v286_v63 = vld [vmem:[%s1349_s1 + $0x18] sm:$0xff] (!%p729_p7)  ;;  %v360_v23 = vsub.s32 (!%p729_p7), %v357_v13, %v359_v17  ;;  %v376_v25 = vadd.s32 (!%p729_p7), 4294967272, %v357_v13  ;;  %v383_v28 = vadd.s32 (!%p729_p7), 4294967264, %v357_v13 }
  0x5b   : > { %275 = vst [vmem:[#allocation3 + $0x20] sm:$0xff] %v259_v35  ;;  %276 = vst [vmem:[#allocation3 + $0x28] sm:$0xff] %v260_v39  ;;  %v292_v43 = vld [vmem:[#allocation2] sm:$0xff] (!%p729_p7)  ;;  %v293_v45 = vld [vmem:[#allocation2 + $0x8] sm:$0xff] (!%p729_p7)  ;;  %v776_v0 = vpack.c.bf16 (!%p729_p7), %v286_v63, %v285_v62  ;;  %v365_v20 = vsub.s32 (!%p729_p7), %v362_v16, %v359_v17  ;;  %v390_v29 = vadd.s32 (!%p729_p7), 4294967256, %v357_v13  ;;  %v372_v31 = vsub.s32 (!%p729_p7), %v369_v22, %v359_v17 }
  0x5c   : > { %277 = vst [vmem:[#allocation3 + $0x30] sm:$0xff] %v261_v40  ;;  %278 = vst [vmem:[#allocation3 + $0x38] sm:$0xff] %v262_v41  ;;  %v294_v42 = vld [vmem:[#allocation2 + $0x10] sm:$0xff] (!%p729_p7)  ;;  %300 = vadd.xlane.f32.xlu0 (!%p729_p7), %v292_v43  ;;  %774 = vmatpush3.bf16.msra.mxu0 (!%p729_p7), %v773_v60  ;;  %v287_v1 = vld [vmem:[%s1349_s1 + $0x20] sm:$0xff] (!%p729_p7)  ;;  %v397_v33 = vadd.s32 (!%p729_p7), 4294967248, %v357_v13  ;;  %v379_v35 = vsub.s32 (!%p729_p7), %v376_v25, %v359_v17  ;;  %v404_v39 = vadd.s32 (!%p729_p7), 4294967240, %v357_v13 }
  0x5d   : > { %304 = vadd.xlane.f32.xlu1 %v294_v42  ;;  %v295_v44 = vld [vmem:[#allocation2 + $0x18] sm:$0xff]  ;;  %v296_v49 = vld [vmem:[#allocation2 + $0x20] sm:$0xff]  ;;  %775 = vmatprep.subr.bf16.mxu0 %v1058_v61  ;;  %v288_v2 = vld [vmem:[%s1349_s1 + $0x28] sm:$0xff]  ;;  %v386_v40 = vsub.s32 %v383_v28, %v359_v17  ;;  %v393_v42 = vsub.s32 %v390_v29, %v359_v17  ;;  %vm541_vm10 = vcmask 1043456   ;;  %vm537_vm11 = vcmask 31744  }
  0x5e   : > { %v297_v51 = vld [vmem:[#allocation2 + $0x28] sm:$0xff]  ;;  %v779_v3 = vpack.c.bf16 %v288_v2, %v287_v1  ;;  %v289_v4 = vld [vmem:[%s1349_s1 + $0x30] sm:$0xff]  ;;  %v290_v5 = vld [vmem:[%s1349_s1 + $0x38] sm:$0xff]  ;;  %vm625_vm12 = vcmask 516096  }
  0x5f   : > { %v298_v53 = vld [vmem:[#allocation2 + $0x30] sm:$0xff]  ;;  %v299_v55 = vld [vmem:[#allocation2 + $0x38] sm:$0xff]  ;;  %v782_v6 = vpack.c.bf16 %v290_v5, %v289_v4 }
  0x60   : > { %302 = vadd.xlane.f32.xlu0 %v293_v45  ;;  %v325_v46 = vld [vmem:[#allocation3 + $0x8] sm:$0xff]  ;;  %v324_v47 = vld [vmem:[#allocation3] sm:$0xff]  ;;  %777 = vmatpush3.bf16.msra.mxu0 %v776_v0 }
  0x61   : > { %306 = vadd.xlane.f32.xlu1 %v295_v44  ;;  %v326_v48 = vld [vmem:[#allocation3 + $0x10] sm:$0xff]  ;;  %v327_v50 = vld [vmem:[#allocation3 + $0x18] sm:$0xff]  ;;  %778 = vmatprep.subr.bf16.mxu0 %v1058_v61 }
  0x62   : > { %v328_v52 = vld [vmem:[#allocation3 + $0x20] sm:$0xff]  ;;  %v329_v54 = vld [vmem:[#allocation3 + $0x28] sm:$0xff] }
  0x63   : > { %v330_v56 = vld [vmem:[#allocation3 + $0x30] sm:$0xff]  ;;  %v331_v57 = vld [vmem:[#allocation3 + $0x38] sm:$0xff] }
  0x64   : > { %332 = vmax.xlane.f32.xlu0 %v324_v47  ;;  %780 = vmatpush3.bf16.msra.mxu0 %v779_v3 }
  0x65   : > { %334 = vmax.xlane.f32.xlu1 %v325_v46  ;;  %781 = vmatprep.subr.bf16.mxu0 %v1058_v61 }
  0x68   : > { %308 = vadd.xlane.f32.xlu0 %v296_v49  ;;  %783 = vmatpush3.bf16.msra.mxu0 %v782_v6  ;;  %v400_v49 = vsub.s32 %v397_v33, %v359_v17 }
  0x69   : > { %336 = vmax.xlane.f32.xlu1 %v326_v48 }
  0x6c   : > { %310 = vadd.xlane.f32.xlu0 %v297_v51 }
  0x6d   : > { %338 = vmax.xlane.f32.xlu1 %v327_v50 }
  0x70   : > { %312 = vadd.xlane.f32.xlu0 %v298_v53 }
  0x71   : > { %340 = vmax.xlane.f32.xlu1 %v328_v52 }
  0x74   : > { %314 = vadd.xlane.f32.xlu0 %v299_v55 }
  0x75   : > { %342 = vmax.xlane.f32.xlu1 %v329_v54  ;;  %v407_v54 = vsub.s32 %v404_v39, %v359_v17  ;;  %v291_v17 = vld [vmem:[%s1350_s2] sm:$0xf] }
  0x76   : > { %768 = vmatpush3.msk.msra.mxu1 %vm541_vm10, %v291_v17 }
  0x78   : > { %344 = vmax.xlane.f32.xlu0 %v330_v56 }
  0x79   : > { %346 = vmax.xlane.f32.xlu1 %v331_v57 }
  0xe9   : > { %v301_v9 = vpop.xlane.xlu0 %300 }
  0xea   : > { %v305_v8 = vpop.xlane.xlu1 %304  ;;  %v316_v24 = vmul.f32 0.00390625, %v301_v9 }
  0xeb   : > { %v318_v32 = vmul.f32 0.00390625, %v305_v8 }
  0xec   : > { %v361_v34 = vrot.slane %v316_v24, %v360_v23 }
  0xed   : > { %v303_v12 = vpop.xlane.xlu0 %302  ;;  %v373_v47 = vrot.slane %v318_v32, %v372_v31 }
  0xee   : > { %v307_v11 = vpop.xlane.xlu1 %306  ;;  %v317_v21 = vmul.f32 0.00390625, %v303_v12 }
  0xef   : > { %v319_v36 = vmul.f32 0.00390625, %v307_v11 }
  0xf0   : > { %v366_v30 = vrot.slane %v317_v21, %v365_v20 }
  0xf1   : > { %v333_v15 = vpop.xlane.xlu0 %332  ;;  %v380_v51 = vrot.slane %v319_v36, %v379_v35 }
  0xf2   : > { %v335_v14 = vpop.xlane.xlu1 %334  ;;  %v368_v43 = vsel %vm367_vm1, %v366_v30, %v361_v34  ;;  %v423_v45 = vrot.slane %v333_v15, %v360_v23 }
  0xf3   : > { %v427_v44 = vrot.slane %v335_v14, %v365_v20  ;;  %v375_v56 = vsel %vm374_vm2, %v373_v47, %v368_v43 }
  0xf4   : > { %v382_v1 = vsel %vm381_vm3, %v380_v51, %v375_v56 }
  0xf5   : > { %v309_v19 = vpop.xlane.xlu0 %308  ;;  %v428_v60 = vsel %vm367_vm1, %v427_v44, %v423_v45 }
  0xf6   : > { %v337_v18 = vpop.xlane.xlu1 %336  ;;  %v320_v41 = vmul.f32 0.00390625, %v309_v19 }
  0xf7   : > { %v432_v48 = vrot.slane %v337_v18, %v372_v31 }
  0xf8   : > { %v387_v57 = vrot.slane %v320_v41, %v386_v40 }
  0xf9   : > { %v311_v27 = vpop.xlane.xlu0 %310  ;;  %v433_v63 = vsel %vm374_vm2, %v432_v48, %v428_v60 }
  0xfa   : > { %v339_v26 = vpop.xlane.xlu1 %338  ;;  %v321_v46 = vmul.f32 0.00390625, %v311_v27  ;;  %v389_v6 = vsel %vm388_vm4, %v387_v57, %v382_v1 }
  0xfb   : > { %v437_v52 = vrot.slane %v339_v26, %v379_v35 }
  0xfc   : > { %v394_v61 = vrot.slane %v321_v46, %v393_v42 }
  0xfd   : > { %v313_v38 = vpop.xlane.xlu0 %312  ;;  %v438_v2 = vsel %vm381_vm3, %v437_v52, %v433_v63 }
  0xfe   : > { %v341_v37 = vpop.xlane.xlu1 %340  ;;  %v322_v50 = vmul.f32 0.00390625, %v313_v38  ;;  %v396_v10 = vsel %vm395_vm5, %v394_v61, %v389_v6 }
  0xff   : > { %v442_v58 = vrot.slane %v341_v37, %v386_v40 }
 0x100   : > { %v401_v0 = vrot.slane %v322_v50, %v400_v49 }
 0x101   : > { %v315_v55 = vpop.xlane.xlu0 %314  ;;  %v443_v7 = vsel %vm388_vm4, %v442_v58, %v438_v2 }
 0x102   : > { %v343_v53 = vpop.xlane.xlu1 %342  ;;  %v323_v59 = vmul.f32 0.00390625, %v315_v55  ;;  %v403_v12 = vsel %vm402_vm6, %v401_v0, %v396_v10 }
 0x103   : > { %v447_v62 = vrot.slane %v343_v53, %v393_v42 }
 0x104   : > { %v408_v3 = vrot.slane %v323_v59, %v407_v54 }
 0x105   : > { %v345_v4 = vpop.xlane.xlu0 %344  ;;  %v448_v11 = vsel %vm395_vm5, %v447_v62, %v443_v7 }
 0x106   : > { %v347_v5 = vpop.xlane.xlu1 %346  ;;  %v452_v8 = vrot.slane %v345_v4, %v400_v49  ;;  %v410_v15 = vsel %vm409_vm7, %v408_v3, %v403_v12 }
 0x107   : > { %v457_v9 = vrot.slane %v347_v5, %v407_v54 }
 0x108   : > { %v453_v13 = vsel %vm402_vm6, %v452_v8, %v448_v11 }
 0x109   : > { %v458_v14 = vsel %vm409_vm7, %v457_v9, %v453_v13 }
 0x10a   : > { %v461_v16 = vsel %vm460_vm8, %v410_v15, %v458_v14 }
 0x10b   : > { %765 = vmatmul.mubr.msk.f32.vlgmr.msra.gmra.mrb[0].mxu0 %vm462_vm9, %v461_v16 }
 0x1de   : > { %v532_v18 = vpop.f32.mrb[0].mxu0 }
 0x1df   : > { %v536_v19 = vmax.f32 %v532_v18, 0.0  ;;  %v766_v20 = vpop.f32.mrb[1].mxu0 }
 0x1e1   : > { %770 = vmatmul.mubr.msk.f32.vlgmr.msra.gmra.mrb[0].mxu1 %vm537_vm11, %v536_v19 }
 0x2b4   : > { %v611_v21 = vpop.f32.mrb[0].mxu1 }
 0x2b5   : > { %v616_v22 = vrot.slane %v611_v21, 1  ;;  %v771_v23 = vpop.f32.mrb[1].mxu1 }
 0x2b7   : > { %v618_v24 = vadd.f32 %v616_v22, %v611_v21 }
 0x2b9   : > { %v733_v25 = vmul.f32 -1.442695, %v618_v24 }
 0x2bb   : > { %894 = vpow2.f32 %v733_v25 }
 0x2c5   : > { %v895_v26 = vpop.eup %894 }
 0x2c6   : > { %v622_v27 = vadd.f32 1.0, %v895_v26 }
 0x2c8   : > { %896 = vrcp.f32 %v622_v27 }
 0x2d2   : > { %v897_v28 = vpop.eup %896 }
 0x2d3   : > { %626 = vst.msk [vmem:[%s1237_s6] sm:$0x1] %vm625_vm12, %v897_v28 }
 0x2d4 PF: > { %s734_s29 = sshll.u32 %s1038_s19, 4  ;;  %s640_s30 = sshll.u32 %s1237_s6, 4  ;;  %s641_s30 = int_to_ptr.vmem [resolvable:$true] %s640_s30 }
 0x2d5   : > { %s1289_s11 = scalar_lea.hbm %s1351_s3, %s734_s29  ;;  %s628_s25 = scalar_lea.sflag [#allocation6], %s201_s24 }
 0x2d6   : > { %s928_s18 = scalar_lea.vmem %s641_s30, 16  ;;  %p1362_p4 = scmp.ne.s32.totalorder %s1359_s7, 0 }
 0x2d7   : > { %p929_p2 = scmp.ne.s32.totalorder %s641_s30, %s928_s18  ;;  %s1061_s4 = smov [#allocation7]  }
 0x2d8   : > { %s932_s27 = sshll.u32 %s1061_s4, 4  ;;  %s933_s27 = int_to_ptr.vmem [resolvable:$false] %s932_s27 }
 0x2d9   : > { %p930_p0 = pnand %p929_p2, %p1362_p4  ;;  %s934_s15 = scalar_lea.vmem %s933_s27, 32 }
 0x2da   : > { %p935_p5 = scmp.lt.s32.totalorder %s641_s30, %s933_s27  ;;  %p936_p8 = scmp.lt.s32.totalorder %s934_s15, %s928_s18 }
 0x2db   : > { %p931_p1 = pneg %p930_p0 }
 0x2dc   : > { %p937_p3 = por %p936_p8, %p935_p5 }
 0x2de   : > { %p938_p10 = pnand %p937_p3, %p931_p1 }
 0x2e0   : > { %941 = shalt.err (!%p938_p10)
}
 0x2e1   : > { %s942_s19 = scalar_lea.hbm %s1289_s11, 16  ;;  %s946_s26 = scalar_lea.hbm %s1351_s3, 32 }
 0x2e2   : > { %p943_p11 = scmp.ne.s32.totalorder %s1289_s11, %s942_s19  ;;  %p947_p13 = scmp.lt.u32.totalorder %s1289_s11, %s1351_s3 }
 0x2e3   : > { %p948_p12 = scmp.lt.u32.totalorder %s946_s26, %s942_s19  ;;  %p950_p2 = scmp.lt.u32.totalorder %s942_s19, %s1289_s11 }
 0x2e4   : > { %p944_p6 = pnand %p943_p11, %p1362_p4 }
 0x2e5   : > { %p949_p7 = por %p948_p12, %p947_p13 }
 0x2e6   : > { %p945_p9 = pneg %p944_p6 }
 0x2e7   : > { %p951_p0 = por %p950_p2, %p949_p7 }
 0x2e9   : > { %p952_p1 = pnand %p951_p0, %p945_p9 }
 0x2eb   : > { %955 = shalt.err (!%p952_p1)
}
 0x2ec   : > { %786 = dma.vmem_to_hbm [thread:$0]  (%p1362_p4), %s641_s30, 16, %s1289_s11, %s628_s25  }
 0x2ed PF: > { %p797_p5 = scmp.ge.s32.totalorder %s1050_s22, 2  ;;  %s652_s28 = sand.u32 1, %s1010_s12  }
 0x2ee   : > { %p1363_p8 = scmp.ne.s32.totalorder %s1360_s10, 0  ;;  %s653_s5 = scalar_lea.sflag [#allocation6], %s652_s28 }
 0x2f0   : > { %p793_p3 = pnand %p797_p5, %p1363_p8 }
 0x2f2   : > { %1005 = dma.done.wait (!%p793_p3), %s653_s5, 16  }
 0x2f3   : > { %1007 = vsyncadd (!%p793_p3), %s653_s5, 4294967280  ;;  %s19_s22 = sadd.s32 1, %s1050_s22   ;;  %s1364_s7 = sld [smem:[#allocation10_spill]] }
 0x2f4   : > { %p16_p10 = scmp.ge.s32.totalorder %s19_s22, 6   ;;  %s1365_s11 = sld [smem:[#allocation11_spill]] }
 0x2f5   : > { %s1366_s12 = smov %s1014_s13  ;;  %s1367_s13 = smov %s1018_s14 }
 0x2f6   : > { %s1368_s14 = smov %s1169_s8  ;;  %s1369_s15 = smov %s1026_s16 }
 0x2f7   : > { %s1370_s16 = smov %s1030_s17  ;;  %s1371_s17 = smov %s1172_s9 }
 0x2f8   : > { %s1372_s18 = smov %s1042_s20  ;;  %s1373_s19 = smov %s1046_s21 }
 0x2f9   : > { %s1374_s20 = smov %s1364_s7  ;;  %18 = sbr.rel (!%p16_p10) target bundleno = 9 (0x9), region = 85 }
 0x2fa   : > { %s1375_s21 = smov %s1365_s11 }
 0x300   :  { %657 = vsyncpa [#allocation5], 1 }
 0x301   :  { %659 = vsyncpa [#allocation5 + $0x1], 1 }
 0x302   :  { %660 = vsyncpa [#allocation6], 1 }
 0x303   :  { %662 = vsyncpa [#allocation6 + $0x1], 1 }

</bundles_post_ra>
